<compile_context>
chip_gen: v6e
topology: v6e:2x2x1
jax: 0.10.0
libtpu: 0.0.40
codegen_flags: <defaults>
</compile_context>

<pallas_src>
import functools

import jax
import jax.numpy as jnp
from jax import lax
from jax.experimental import pallas as pl
from jax.experimental.pallas import tpu as pltpu


def _round_up(x, m):
    return (x + m - 1) // m * m


def _cdiv(a, b):
    return -(-a // b)


def _phys_vmem_bytes():
    try:
        info = pltpu.get_tpu_info()
        cap = int(getattr(info, "vmem_capacity_bytes", 0))
        if cap > 0:
            return cap
    except Exception:
        pass
    return 64 * 1024 * 1024  # conservative (v7x-sized) fallback; safe on all gens


def _plan(N, C, HW, itemsize, budget, tile_m=None, bn=None):
    """Pick (tile_m, nb, bn, nbb, P, ki, step_need) under an honest VMEM model."""
    # Sublane granule by element size: f32 -> 8, bf16 -> 16, int8/fp8 -> 32.
    gran = max(8, 32 // max(1, itemsize))
    c_in = _round_up(C, gran)      # padded channels of the stored input tiles
    c_f32 = _round_up(C, 8)        # padded channels of the f32 working copies

    def step_bytes(b, t):
        io = 2 * 2 * b * c_in * t * itemsize                      # 2 inputs x 2 buffers
        work = (4 if itemsize != 4 else 2) * b * c_f32 * t * 4    # upcasts + elementwise temps
        aux = 8 * b * t * 4                                       # out block + per-position rows
        return io + work + aux

    # ---- lane tile ----
    per_lane = step_bytes(1, 1)
    cap = max(128, (budget // per_lane) // 128 * 128)
    if tile_m is None:
        if HW <= cap:
            tile_m = HW                 # full-extent block is always legal
        else:
            tile_m = cap
            # Accept an exact divisor only if it keeps the tile large
            # (>= cap/2 and >= 1024); otherwise big tile + masked remainder.
            t = cap
            floor_t = max(cap // 2, 1024)
            while t >= floor_t:
                if HW % t == 0:
                    tile_m = t
                    break
                t -= 128
    tile_m = min(tile_m, HW)
    nb = _cdiv(HW, tile_m)

    # ---- batch block: amortize the fixed per-grid-step cost ----
    if bn is None:
        target = 4 * 1024 * 1024        # ~4 MiB of real input bytes per grid step
        per_n = 2 * C * tile_m * itemsize
        bn_tgt = max(1, target // max(1, per_n))
        bn_fit = max(1, budget // max(1, step_bytes(1, tile_m)))
        bn = max(1, min(N, bn_tgt, bn_fit))
        if bn < N and N % bn != 0:
            # Prefer a divisor of N (no row masking) only if it stays large.
            for d in range(bn, 0, -1):
                if N % d == 0 and 4 * d >= 3 * bn:
                    bn = d
                    break
    bn = max(1, min(bn, N))
    nbb = _cdiv(N, bn)

    # ---- megacore: ensure >= 2 parallel grid blocks when the problem allows ----
    P = 1
    if nbb == 1:
        if nb >= 2:
            P = 2                        # split the spatial reduction in two
        elif N >= 2:
            bn = _cdiv(N, 2)             # split the single batch block instead
            nbb = _cdiv(N, bn)
    ki = _cdiv(nb, P)

    return tile_m, nb, bn, nbb, P, ki, step_bytes(bn, tile_m)


def _norm_loss_kernel(x_ref, g_ref, o_ref, *, n, hw, bn, tile, ki, nbb, eps,
                      need_lane, need_row):
    """x_ref, g_ref: (bn, C, tile) input tiles. o_ref: (bn, tile) |cos| partial sums."""
    b = pl.program_id(0)          # batch-block axis (parallel)
    p = pl.program_id(1)          # spatial parallel chunk (parallel)
    i = pl.program_id(2)          # spatial reduction step (arbitrary)
    g = p * ki + i                # global spatial block index (may overshoot)

    @pl.when(i == 0)
    def _init():
        o_ref[...] = jnp.zeros_like(o_ref)

    x = x_ref[...].astype(jnp.float32)    # (bn, C, tile)
    w = g_ref[...].astype(jnp.float32)

    dot = jnp.sum(x * w, axis=1)          # (bn, tile)
    xx = jnp.sum(x * x, axis=1)
    ww = jnp.sum(w * w, axis=1)
    # cos = dot / max(||x||*||w||, eps) == dot * rsqrt(max(xx*ww, eps^2))
    inv = lax.rsqrt(jnp.maximum(xx * ww, jnp.float32(eps * eps)))
    val = jnp.abs(dot * inv)              # |cos|; the (1 - .) is folded into the epilogue

    if need_lane or need_row:
        cond = None
        if need_lane:
            cond = (g + 1) * tile > hw
        if need_row:
            last_b = b == (nbb - 1)
            cond = last_b if cond is None else jnp.logical_or(cond, last_b)

        @pl.when(cond)
        def _edge():                      # only edge blocks pay for the mask
            valid = None
            if need_lane:
                lane = lax.broadcasted_iota(jnp.int32, (bn, tile), 1)
                valid = (g * tile + lane) < hw
            if need_row:
                row = lax.broadcasted_iota(jnp.int32, (bn, tile), 0)
                rvalid = (b * bn + row) < n
                valid = rvalid if valid is None else jnp.logical_and(valid, rvalid)
            o_ref[...] += jnp.where(valid, val, jnp.float32(0.0))

        @pl.when(jnp.logical_not(cond))
        def _plain():
            o_ref[...] += val
    else:
        o_ref[...] += val


def norm_loss(x_nchw, norm_nchw, *, tile_m=None, bn=None, eps=1e-6):
    """x_nchw, norm_nchw: [N, C, H, W]. Returns scalar loss (float32)."""
    assert x_nchw.shape == norm_nchw.shape
    N, C, H, W = x_nchw.shape
    HW = H * W
    M = N * HW

    # Free, contiguous reshape (no transpose, no extra HBM pass).
    x3 = x_nchw.reshape(N, C, HW)
    g3 = norm_nchw.reshape(N, C, HW)

    itemsize = max(jnp.dtype(x_nchw.dtype).itemsize,
                   jnp.dtype(norm_nchw.dtype).itemsize)

    phys = _phys_vmem_bytes()
    budget = min(phys // 4, 32 * 1024 * 1024)    # generation-aware per-step budget

    tile_m, nb, bn, nbb, P, ki, step_need = _plan(
        N, C, HW, itemsize, budget, tile_m=tile_m, bn=bn)

    # TODO(synk): very large C (thousands) should reduce over channel chunks with
    # dot/xx/ww scratch accumulators instead of a single full-C block.
    vmem_limit = max(step_need * 3 // 2 + (2 << 20), 32 << 20)
    vmem_limit = min(vmem_limit, phys - (8 << 20))

    need_lane = (HW % tile_m != 0) or (P * ki != nb)
    need_row = (N % bn != 0)

    if P * ki == nb:
        def sp_idx(b_, p_, i_):
            return (b_, 0, p_ * ki + i_)
    else:
        # Overshoot steps are clamped to the last spatial block; their lanes are
        # fully masked in-kernel so they contribute exactly zero.
        def sp_idx(b_, p_, i_):
            return (b_, 0, jnp.minimum(p_ * ki + i_, nb - 1))

    kernel = functools.partial(
        _norm_loss_kernel, n=N, hw=HW, bn=bn, tile=tile_m, ki=ki, nbb=nbb,
        eps=eps, need_lane=need_lane, need_row=need_row)

    cost = pl.CostEstimate(
        flops=int(M) * (6 * C + 6),
        transcendentals=int(M),
        bytes_accessed=int(2 * N * C * HW * itemsize + nbb * P * bn * tile_m * 4),
    )

    partials = pl.pallas_call(
        kernel,
        out_shape=jax.ShapeDtypeStruct((nbb, P, bn, tile_m), jnp.float32),
        grid_spec=pltpu.PrefetchScalarGridSpec(
            num_scalar_prefetch=0,
            grid=(nbb, P, ki),
            in_specs=[
                pl.BlockSpec((bn, C, tile_m), sp_idx),
                pl.BlockSpec((bn, C, tile_m), sp_idx),
            ],
            out_specs=pl.BlockSpec((None, None, bn, tile_m),
                                   lambda b_, p_, i_: (b_, p_, 0, 0)),
        ),
        compiler_params=pltpu.CompilerParams(
            dimension_semantics=("parallel", "parallel", "arbitrary"),
            vmem_limit_bytes=int(vmem_limit),
        ),
        cost_estimate=cost,
    )(x3, g3)

    # loss = mean(1 - |cos|) = 1 - sum(|cos|)/M   (masked lanes contribute 0)
    return jnp.float32(1.0) - jnp.sum(partials) / jnp.float32(M)


def norm_loss_ref(x, norm, eps=1e-6):
    """Pure-JAX reference mirroring torch.nn.CosineSimilarity(dim=1, eps=1e-6)."""
    dot = jnp.sum(x * norm, axis=1)
    nx = jnp.sqrt(jnp.sum(x * x, axis=1))
    nn_ = jnp.sqrt(jnp.sum(norm * norm, axis=1))
    cos = dot / jnp.maximum(nx * nn_, eps)
    return jnp.mean(1.0 - jnp.abs(cos))


if __name__ == "__main__":
    key = jax.random.PRNGKey(0)
    kx, kn = jax.random.split(key)

    # Base case (the module's typical small config).
    N, C, H, W = 2, 4, 16, 16
    x = jax.random.normal(kx, (N, C, H, W), dtype=jnp.float32)
    # Deterministic "norm" parameter (the module's __init__ just stores it):
    norm = jax.random.normal(kn, (N, C, H, W), dtype=jnp.float32)
    out = norm_loss(x, norm)
    jax.block_until_ready(out)
    ref = norm_loss_ref(x, norm)
    assert jnp.allclose(out, ref, atol=1e-5, rtol=1e-5), (out, ref)

    # Remainder lanes + spatial-parallel (P=2) path with a clamped overshoot block.
    k1, k2 = jax.random.split(kn)
    x1 = jax.random.normal(k1, (1, 4, 16, 20), dtype=jnp.float32)
    n1 = jax.random.normal(k2, (1, 4, 16, 20), dtype=jnp.float32)
    out1 = norm_loss(x1, n1, tile_m=128)
    jax.block_until_ready(out1)
    assert jnp.allclose(out1, norm_loss_ref(x1, n1), atol=1e-5, rtol=1e-5)

    # Batch blocking with a partial (row-masked) last batch block.
    k3, k4 = jax.random.split(k2)
    x2 = jax.random.normal(k3, (3, 4, 8, 16), dtype=jnp.float32)
    n2 = jax.random.normal(k4, (3, 4, 8, 16), dtype=jnp.float32)
    out2 = norm_loss(x2, n2, bn=2)
    jax.block_until_ready(out2)
    assert jnp.allclose(out2, norm_loss_ref(x2, n2), atol=1e-5, rtol=1e-5)

    # bf16 inputs (HBM traffic halved; math upcast to f32 in-kernel).
    k5, k6 = jax.random.split(k4)
    x3 = jax.random.normal(k5, (2, 3, 16, 16), dtype=jnp.bfloat16)
    n3 = jax.random.normal(k6, (2, 3, 16, 16), dtype=jnp.bfloat16)
    out3 = norm_loss(x3, n3)
    jax.block_until_ready(out3)
    ref3 = norm_loss_ref(x3.astype(jnp.float32), n3.astype(jnp.float32))
    assert jnp.allclose(out3, ref3, atol=1e-4, rtol=1e-4)

    print("KERNEL_OK")
</pallas_src>

<mosaic_0001>
module attributes {stable_mosaic.version = 11 : i64} {
  func.func @_norm_loss_kernel(%arg0: i32, %arg1: i32, %arg2: i32, %arg3: memref<1x4x256xf32, #tpu.memory_space<vmem>>, %arg4: memref<1x4x256xf32, #tpu.memory_space<vmem>>, %arg5: memref<1x1x1x256xf32, #tpu.memory_space<vmem>>) attributes {dimension_semantics = [#tpu.dimension_semantics<parallel>, #tpu.dimension_semantics<parallel>, #tpu.dimension_semantics<arbitrary>], iteration_bounds = array<i64: 2, 1, 1>, scalar_prefetch = 0 : i64, scratch_operands = 0 : i64, tpu.core_type = #tpu.core_type<tc>, window_params = [{transform_indices = @transform_0, window_bounds = array<i64: 1, 4, 256>}, {transform_indices = @transform_1, window_bounds = array<i64: 1, 4, 256>}, {transform_indices = @transform_2, window_bounds = array<i64: 1, 1, 1, 256>}]} {
    %c0_i32 = arith.constant 0 : i32
    %0 = arith.cmpi eq, %arg2, %c0_i32 : i32
    %1 = arith.extui %0 : i1 to i32
    %c0_i32_0 = arith.constant 0 : i32
    %2 = arith.cmpi ne, %1, %c0_i32_0 : i32
    scf.if %2 {
      %cst_17 = arith.constant 0.000000e+00 : f32
      %23 = vector.broadcast %cst_17 : f32 to vector<1x256xf32>
      %c0_18 = arith.constant 0 : index
      %c0_19 = arith.constant 0 : index
      %c0_20 = arith.constant 0 : index
      %c0_21 = arith.constant 0 : index
      %24 = vector.load %arg5[%c0_18, %c0_19, %c0_20, %c0_21] : memref<1x1x1x256xf32, #tpu.memory_space<vmem>>, vector<1x1x1x256xf32>
      %25 = vector.shape_cast %24 : vector<1x1x1x256xf32> to vector<1x256xf32>
      %26 = vector.shape_cast %23 : vector<1x256xf32> to vector<1x1x1x256xf32>
      tpu.vector_store %arg5[%c0_18, %c0_19, %c0_20, %c0_21], %26 {strides = array<i32>} : memref<1x1x1x256xf32, #tpu.memory_space<vmem>>, vector<1x1x1x256xf32>,
    } else {
    }
    %c0 = arith.constant 0 : index
    %c0_1 = arith.constant 0 : index
    %c0_2 = arith.constant 0 : index
    %3 = vector.load %arg3[%c0, %c0_1, %c0_2] : memref<1x4x256xf32, #tpu.memory_space<vmem>>, vector<1x4x256xf32>
    %c0_3 = arith.constant 0 : index
    %c0_4 = arith.constant 0 : index
    %c0_5 = arith.constant 0 : index
    %4 = vector.load %arg4[%c0_3, %c0_4, %c0_5] : memref<1x4x256xf32, #tpu.memory_space<vmem>>, vector<1x4x256xf32>
    %5 = arith.mulf %3, %4 : vector<1x4x256xf32>
    %cst = arith.constant dense<0.000000e+00> : vector<1x256xf32>
    %6 = vector.multi_reduction <add>, %5, %cst [1] : vector<1x4x256xf32> to vector<1x256xf32>
    %7 = arith.mulf %3, %3 : vector<1x4x256xf32>
    %cst_6 = arith.constant dense<0.000000e+00> : vector<1x256xf32>
    %8 = vector.multi_reduction <add>, %7, %cst_6 [1] : vector<1x4x256xf32> to vector<1x256xf32>
    %9 = arith.mulf %4, %4 : vector<1x4x256xf32>
    %cst_7 = arith.constant dense<0.000000e+00> : vector<1x256xf32>
    %10 = vector.multi_reduction <add>, %9, %cst_7 [1] : vector<1x4x256xf32> to vector<1x256xf32>
    %11 = arith.mulf %8, %10 : vector<1x256xf32>
    %cst_8 = arith.constant 9.99999996E-13 : f32
    %12 = vector.broadcast %cst_8 : f32 to vector<1x256xf32>
    %13 = arith.maximumf %11, %12 : vector<1x256xf32>
    %14 = math.rsqrt %13 : vector<1x256xf32>
    %15 = arith.mulf %6, %14 : vector<1x256xf32>
    %16 = math.absf %15 : vector<1x256xf32>
    %c0_9 = arith.constant 0 : index
    %c0_10 = arith.constant 0 : index
    %c0_11 = arith.constant 0 : index
    %c0_12 = arith.constant 0 : index
    %17 = vector.load %arg5[%c0_9, %c0_10, %c0_11, %c0_12] : memref<1x1x1x256xf32, #tpu.memory_space<vmem>>, vector<1x1x1x256xf32>
    %18 = vector.shape_cast %17 : vector<1x1x1x256xf32> to vector<1x256xf32>
    %19 = arith.addf %18, %16 : vector<1x256xf32>
    %c0_13 = arith.constant 0 : index
    %c0_14 = arith.constant 0 : index
    %c0_15 = arith.constant 0 : index
    %c0_16 = arith.constant 0 : index
    %20 = vector.load %arg5[%c0_13, %c0_14, %c0_15, %c0_16] : memref<1x1x1x256xf32, #tpu.memory_space<vmem>>, vector<1x1x1x256xf32>
    %21 = vector.shape_cast %20 : vector<1x1x1x256xf32> to vector<1x256xf32>
    %22 = vector.shape_cast %19 : vector<1x256xf32> to vector<1x1x1x256xf32>
    tpu.vector_store %arg5[%c0_13, %c0_14, %c0_15, %c0_16], %22 {strides = array<i32>} : memref<1x1x1x256xf32, #tpu.memory_space<vmem>>, vector<1x1x1x256xf32>,
    return
  }
  func.func @transform_0(%arg0: i32, %arg1: i32, %arg2: i32) -> (i32, i32, i32) {
    %c1_i32 = arith.constant 1 : i32
    %0 = arith.muli %arg1, %c1_i32 : i32
    %1 = arith.addi %0, %arg2 : i32
    %c0_i32 = arith.constant 0 : i32
    %c0_i32_0 = arith.constant 0 : i32
    return %arg0, %c0_i32, %1 : i32, i32, i32
  }
  func.func @transform_1(%arg0: i32, %arg1: i32, %arg2: i32) -> (i32, i32, i32) {
    %c1_i32 = arith.constant 1 : i32
    %0 = arith.muli %arg1, %c1_i32 : i32
    %1 = arith.addi %0, %arg2 : i32
    %c0_i32 = arith.constant 0 : i32
    %c0_i32_0 = arith.constant 0 : i32
    return %arg0, %c0_i32, %1 : i32, i32, i32
  }
  func.func @transform_2(%arg0: i32, %arg1: i32, %arg2: i32) -> (i32, i32, i32, i32) {
    %c0_i32 = arith.constant 0 : i32
    %c0_i32_0 = arith.constant 0 : i32
    %c0_i32_1 = arith.constant 0 : i32
    return %arg0, %arg1, %c0_i32, %c0_i32_0 : i32, i32, i32, i32
  }
}

</mosaic_0001>

<bundles_post_ra>
// kernel: tpu_custom_call.1
= control target key start
LH: loop header
LB: loop body
LE: loop exit
PB: predicated region body
PF: predicated region fallthrough
CT: control target
= control target key end

     0   :  { %7 = vsyncpa [#allocation3], 0  ;;  %s911_s0 = inlined_call_operand.hbm [shape: f32[2,4,256], index: 0, kind: input, shape index: {}]   ;;  %s912_s1 = inlined_call_operand.hbm [shape: f32[2,4,256], index: 1, kind: input, shape index: {}]   ;;  %s913_s2 = inlined_call_operand.hbm [shape: f32[2,1,1,256], index: 2, kind: output, shape index: {}]  }
   0x1   :  { %9 = vsyncpa [#allocation3 + $0x1], 0 }
   0x2   :  { %10 = vsyncpa [#allocation6], 0 }
   0x3   :  { %12 = vsyncpa [#allocation6 + $0x1], 0 }
   0x4   :  { %13 = vsyncpa [#allocation4], 0 }
   0x5   :  { %15 = vsyncpa [#allocation4 + $0x1], 0  ;;  %s727_s9 = smov 0   ;;  %s729_s10 = smov 0  }
   0x6   :  { %s731_s11 = smov 0   ;;  %s733_s12 = smov 0  }
   0x7   :  { %s735_s13 = smov 0   ;;  %s737_s14 = smov 0  }
   0x8 LB: > { %s470_s15 = sadd.s32 4294967295, %s705_s14   ;;  %s471_s16 = sadd.s32 4294967294, %s705_s14   ;;  %s705_s14 = sphi %s737_s14, %s21_s14   ;;  %s701_s13 = sphi %s735_s13, %s927_s13   ;;  %s697_s12 = sphi %s733_s12, %s926_s12   ;;  %s693_s11 = sphi %s731_s11, %s925_s11   ;;  %s689_s10 = sphi %s729_s10, %s924_s10   ;;  %s685_s9 = sphi %s727_s9, %s923_s9  }
   0x9   : > { %s40_s17 = sadd.s32 1, %s701_s13  ;;  %s51_s18 = sadd.s32 1, %s693_s11 }
   0xa   : > { %p42_p0 = scmp.ge.s32.totalorder %s40_s17, 2  ;;  %p58_p1 = scmp.ne.s32.totalorder %s693_s11, %s689_s10 }
   0xb   : > { %p59_p2 = scmp.eq.s32.totalorder %s705_s14, 0  ;;  %p64_p3 = scmp.ne.s32.totalorder %s689_s10, %s685_s9 }
   0xc   : > { %s929_s17 = smov (%p42_p0, %s40_s17), 0  ;;  %p65_p5 = scmp.eq.s32.totalorder %s470_s15, 0 }
   0xd   : > { %p768_p4 = por %p59_p2, %p58_p1  ;;  %s46_s20 = ssub.s32 %s701_s13, %s929_s17 }
   0xe   : > { %p120_p6 = scmp.eq.s32.totalorder %s470_s15, 1  ;;  %p49_p7 = scmp.eq.s32.totalorder %s46_s20, 0 }
   0xf   : > { %p774_p8 = por %p65_p5, %p64_p3  ;;  %p126_p10 = scmp.eq.s32.totalorder %s471_s16, 1 }
  0x10   : > { %p778_p9 = por %p120_p6, %p58_p1  ;;  %p509_p13 = scmp.lt.s32.totalorder %s705_s14, 2 }
  0x11   : > { %s783_s23 = scalar_select %p49_p7, %s693_s11, %s51_s18  }
  0x12   : > { %p785_p11 = por %p126_p10, %p64_p3  ;;  %s792_s25 = sand.u32 1, %s693_s11  }
  0x13   : > { %s474_s26 = sshll.u32 %s792_s25, 3  ;;  %s489_s27 = sshll.u32 %s701_s13, 7 }
  0x14   : > { %s159_s30 = scalar_lea.hbm %s911_s0, %s489_s27  ;;  %s150_s3 = scalar_lea.vmem [#allocation2], %s474_s26 }
  0x15   : > { %s161_s4 = sshll.u32 %s150_s3, 4  ;;  %p801_p0 = pnand %p509_p13, %p768_p4  ;;  %s162_s4 = int_to_ptr.vmem [resolvable:$true] %s161_s4 }
  0x16   : > { %p480_p1 = scmp.ge.s32.totalorder %s705_s14, 1  ;;  %p188_p2 = scmp.lt.s32.totalorder %s705_s14, 3 }
  0x17   : > { %s147_s6 = scalar_lea.sflag [#allocation3], %s792_s25  ;;  %p567_p3 = pneg %p801_p0 }
  0x18   : > { %s578_s7 = scalar_lea.vmem %s162_s4, 128  ;;  %s707_s8 = smov [#allocation2]  }
  0x19   : > { %p579_p5 = scmp.ne.s32.totalorder %s162_s4, %s578_s7  ;;  %s583_s15 = sshll.u32 %s707_s8, 4  ;;  %s584_s15 = int_to_ptr.vmem [resolvable:$false] %s583_s15 }
  0x1a   : > { %s585_s16 = scalar_lea.vmem %s584_s15, 256  ;;  %p586_p4 = scmp.lt.s32.totalorder %s162_s4, %s584_s15 }
  0x1b   : > { %p581_p6 = pnand %p579_p5, %p567_p3  ;;  %p587_p10 = scmp.lt.s32.totalorder %s585_s16, %s578_s7 }
  0x1d   : > { %p582_p7 = pneg %p581_p6  ;;  %p588_p13 = por %p587_p10, %p586_p4 }
  0x1f   : > { %p589_p12 = pnand %p588_p13, %p582_p7 }
  0x21   : > { %592 = shalt.err (!%p589_p12)
}
  0x22   : > { %501 = dma.hbm_to_vmem [thread:$0]  (!%p801_p0), %s159_s30, 128, %s162_s4, %s147_s6  }
  0x23   : > { %p819_p5 = pnand %p480_p1, %p188_p2  ;;  %s181_s28 = scalar_lea.hbm %s912_s1, %s489_s27 }
  0x24   : > { %s172_s29 = scalar_lea.vmem [#allocation5], %s474_s26  ;;  %s169_s7 = scalar_lea.sflag [#allocation6], %s792_s25 }
  0x25   : > { %s183_s3 = sshll.u32 %s172_s29, 4  ;;  %s708_s30 = smov [#allocation5]   ;;  %s184_s3 = int_to_ptr.vmem [resolvable:$true] %s183_s3 }
  0x26   : > { %s606_s8 = scalar_lea.vmem %s184_s3, 128  ;;  %s611_s4 = sshll.u32 %s708_s30, 4  ;;  %s612_s4 = int_to_ptr.vmem [resolvable:$false] %s611_s4 }
  0x27   : > { %p607_p12 = scmp.ne.s32.totalorder %s184_s3, %s606_s8  ;;  %s613_s6 = scalar_lea.vmem %s612_s4, 256 }
  0x28   : > { %p614_p1 = scmp.lt.s32.totalorder %s184_s3, %s612_s4  ;;  %p615_p2 = scmp.lt.s32.totalorder %s613_s6, %s606_s8 }
  0x29   : > { %p609_p6 = pnand %p607_p12, %p567_p3 }
  0x2a   : > { %p616_p4 = por %p615_p2, %p614_p1 }
  0x2b   : > { %p610_p7 = pneg %p609_p6 }
  0x2d   : > { %p617_p10 = pnand %p616_p4, %p610_p7 }
  0x2f   : > { %620 = shalt.err (!%p617_p10)
}
  0x30   : > { %504 = dma.hbm_to_vmem [thread:$0]  (!%p801_p0), %s181_s28, 128, %s184_s3, %s169_s7  }
  0x31   : > { %192 = sbr.rel (%p819_p5) target bundleno = 118 (0x76), region = 28  ;;  %s835_s25 = sand.u32 (!%p819_p5), 1, %s689_s10  }
  0x32   : > { %s481_s26 = sshll.u32 (!%p819_p5), %s835_s25, 3  ;;  %s195_s27 = scalar_lea.sflag (!%p819_p5), [#allocation3], %s835_s25 }
  0x33   : > { %s198_s15 = scalar_lea.vmem (!%p819_p5), [#allocation2], %s481_s26 }
  0x36   : > { %672 = dma.done.wait (%p774_p8), %s195_s27, 128  }
  0x37   : > { %674 = vsyncadd (%p774_p8), %s195_s27, 4294967168  ;;  %s204_s5 = scalar_lea.sflag [#allocation6], %s835_s25  ;;  %s207_s16 = scalar_lea.vmem [#allocation5], %s481_s26 }
  0x38   : > { %676 = dma.done.wait (%p774_p8), %s204_s5, 128  }
  0x39   : > { %678 = vsyncadd (%p774_p8), %s204_s5, 4294967168  ;;  %s483_s18 = sshll.u32 %s835_s25, 1  ;;  %v241_v0 = vlaneseq  ;;  %v709_v2 = vmov 0.0   ;;  %v246_v3 = vld [vmem:[%s198_s15] sm:$0xff]  ;;  %v247_v4 = vld [vmem:[%s207_s16] sm:$0xff]  ;;  %vm252_vm1 = vcmask 1043456  }
  0x3a   : > { %s854_s19 = scalar_lea.vmem [#allocation7], %s483_s18  ;;  %v267_v5 = vmul.f32 %v246_v3, %v246_v3  ;;  %v285_v6 = vmul.f32 %v247_v4, %v247_v4  ;;  %v248_v9 = vmul.f32 %v247_v4, %v246_v3  ;;  %v710_v56 = vmov 1966171168   ;;  %s491_s21 = sshll.u32 %s697_s12, 5 }
  0x3b   : > { %vm850_vm0 = vcmp.lt.s32.totalorder %v241_v0, 256  ;;  %v318_v57 = vunpack.c.l.s4 %v710_v56  ;;  %v321_v62 = vshrl.u32 %v241_v0, 7  ;;  %s355_s20 = sshll.u32 %s854_s19, 4  ;;  %s353_s3 = scalar_lea.hbm %s913_s2, %s491_s21  ;;  %s356_s20 = int_to_ptr.vmem [resolvable:$true] %s355_s20 }
  0x3c   : > { %245 = vst.msk [vmem:[%s854_s19] sm:$0x3] %vm850_vm0, %v709_v2  ;;  %v269_v7 = vcombine.high %v267_v5, %v267_v5  ;;  %v271_v8 = vsel %vm252_vm1, %v267_v5, 0.0  ;;  %v287_v11 = vcombine.high %v285_v6, %v285_v6  ;;  %v289_v12 = vsel %vm252_vm1, %v285_v6, 0.0  ;;  %s339_s7 = scalar_lea.sflag [#allocation4], %s835_s25  ;;  %s621_s8 = scalar_lea.vmem %s356_s20, 32 }
  0x3d   : > { %v272_v10 = vrot.slane %v271_v8, 4  ;;  %v290_v14 = vrot.slane %v289_v12, 4  ;;  %v250_v19 = vcombine.high %v248_v9, %v248_v9  ;;  %v253_v20 = vsel %vm252_vm1, %v248_v9, 0.0  ;;  %p622_p8 = scmp.ne.s32.totalorder %s356_s20, %s621_s8  ;;  %s711_s30 = smov [#allocation7]  }
  0x3e   : > { %v278_v13 = vsel %vm252_vm1, %v269_v7, 0.0  ;;  %v296_v18 = vsel %vm252_vm1, %v287_v11, 0.0  ;;  %v254_v27 = vrot.slane %v253_v20, 4  ;;  %v319_v61 = vunpack.c.0.s8 %v318_v57  ;;  %s625_s4 = sshll.u32 %s711_s30, 4  ;;  %s626_s4 = int_to_ptr.vmem [resolvable:$false] %s625_s4 }
  0x3f   : > { %v273_v15 = vadd.f32 %v272_v10, %v271_v8  ;;  %v279_v16 = vrot.slane %v278_v13, 4  ;;  %v291_v17 = vadd.f32 %v290_v14, %v289_v12  ;;  %v297_v24 = vrot.slane %v296_v18, 4  ;;  %p623_p0 = pnand %p622_p8, %p778_p9  ;;  %s627_s12 = scalar_lea.vmem %s626_s4, 64 }
  0x40   : > { %v260_v30 = vsel %vm252_vm1, %v250_v19, 0.0  ;;  %v255_v37 = vadd.f32 %v254_v27, %v253_v20  ;;  %v322_v5 = vsub.s32 %v319_v61, %v321_v62  ;;  %p628_p13 = scmp.lt.s32.totalorder %s356_s20, %s626_s4  ;;  %p629_p5 = scmp.lt.s32.totalorder %s627_s12, %s621_s8 }
  0x41   : > { %v274_v21 = vrot.slane %v273_v15, 2  ;;  %v280_v22 = vadd.f32 %v279_v16, %v278_v13  ;;  %v292_v23 = vrot.slane %v291_v17, 2  ;;  %v298_v29 = vadd.f32 %v297_v24, %v296_v18  ;;  %p624_p3 = pneg %p623_p0 }
  0x42   : > { %v261_v38 = vrot.slane %v260_v30, 4  ;;  %v256_v44 = vrot.slane %v255_v37, 2  ;;  %p630_p12 = por %p629_p5, %p628_p13 }
  0x43   : > { %v275_v25 = vadd.f32 %v274_v21, %v273_v15  ;;  %v281_v26 = vrot.slane %v280_v22, 2  ;;  %v293_v28 = vadd.f32 %v292_v23, %v291_v17  ;;  %v299_v34 = vrot.slane %v298_v29, 2  ;;  %v313_v8 = vld [vmem:[%s854_s19] sm:$0x3] }
  0x44   : > { %v262_v45 = vadd.f32 %v261_v38, %v260_v30  ;;  %v257_v49 = vadd.f32 %v256_v44, %v255_v37  ;;  %p631_p6 = pnand %p630_p12, %p624_p3 }
  0x45   : > { %v276_v31 = vrot.slane %v275_v25, 1  ;;  %v282_v32 = vadd.f32 %v281_v26, %v280_v22  ;;  %v294_v33 = vrot.slane %v293_v28, 1  ;;  %v300_v40 = vadd.f32 %v299_v34, %v298_v29 }
  0x46   : > { %v263_v50 = vrot.slane %v262_v45, 2  ;;  %v258_v52 = vrot.slane %v257_v49, 1 }
  0x47   : > { %v277_v35 = vadd.f32 %v276_v31, %v275_v25  ;;  %v283_v36 = vrot.slane %v282_v32, 1  ;;  %v295_v39 = vadd.f32 %v294_v33, %v293_v28  ;;  %v301_v42 = vrot.slane %v300_v40, 1 }
  0x48   : > { %v264_v53 = vadd.f32 %v263_v50, %v262_v45  ;;  %v259_v54 = vadd.f32 %v258_v52, %v257_v49 }
  0x49   : > { %v284_v41 = vadd.f32 %v283_v36, %v282_v32  ;;  %v303_v43 = vmul.f32 %v295_v39, %v277_v35  ;;  %v302_v46 = vadd.f32 %v301_v42, %v300_v40 }
  0x4a   : > { %v265_v55 = vrot.slane %v264_v53, 1 }
  0x4b   : > { %v305_v47 = vmax.f32 %v303_v43, 1e-12  ;;  %v304_v48 = vmul.f32 %v302_v46, %v284_v41 }
  0x4c   : > { %v266_v59 = vadd.f32 %v265_v55, %v264_v53 }
  0x4d   : > { %561 = vrsqrt.f32 %v305_v47  ;;  %v306_v51 = vmax.f32 %v304_v48, 1e-12 }
  0x4f   : > { %563 = vrsqrt.f32 %v306_v51 }
  0x5a   : > { %v562_v58 = vpop.eup %561 }
  0x5b   : > { %v309_v60 = vmul.f32 %v562_v58, %v259_v54 }
  0x5c   : > { %v564_v63 = vpop.eup %563 }
  0x5d   : > { %v310_v2 = vmul.f32 %v564_v63, %v266_v59  ;;  %v311_v3 = vand.u32 2147483647, %v309_v60 }
  0x5f   : > { %v312_v4 = vand.u32 2147483647, %v310_v2 }
  0x61   : > { %v316_v6 = vcombine.low %v311_v3, %v312_v4 }
  0x63   : > { %v323_v7 = vrot.slane %v316_v6, %v322_v5 }
  0x65   : > { %v330_v9 = vrot.slane %v323_v7, %v322_v5 }
  0x67   : > { %v332_v10 = vadd.f32 %v330_v9, %v313_v8 }
  0x69   : > { %337 = vst.msk [vmem:[%s854_s19] sm:$0x3] %vm850_vm0, %v332_v10 }
  0x6a   : > { %634 = shalt.err (!%p631_p6)
}
  0x6b   : > { %s635_s6 = scalar_lea.hbm %s353_s3, 32  ;;  %s639_s27 = scalar_lea.hbm %s913_s2, 64 }
  0x6c   : > { %p636_p7 = scmp.ne.s32.totalorder %s353_s3, %s635_s6  ;;  %p640_p4 = scmp.lt.s32.totalorder %s353_s3, %s913_s2 }
  0x6d   : > { %p641_p10 = scmp.lt.s32.totalorder %s639_s27, %s635_s6 }
  0x6e   : > { %p637_p1 = pnand %p636_p7, %p778_p9 }
  0x6f   : > { %p642_p8 = por %p641_p10, %p640_p4 }
  0x70   : > { %p638_p2 = pneg %p637_p1 }
  0x72   : > { %p643_p0 = pnand %p642_p8, %p638_p2 }
  0x74   : > { %646 = shalt.err (!%p643_p0)
}
  0x75   : > { %496 = dma.vmem_to_hbm [thread:$0]  (%p778_p9), %s356_s20, 32, %s353_s3, %s339_s7  }
  0x76 PF: > { %s367_s16 = sand.u32 1, %s685_s9   ;;  %p922_p3 = scmp.ge.s32.totalorder %s705_s14, 2 }
  0x77   : > { %s368_s18 = scalar_lea.sflag [#allocation4], %s367_s16 }
  0x78   : > { %p506_p13 = pnand %p922_p3, %p785_p11 }
  0x7a   : > { %p507_p5 = pneg %p506_p13 }
  0x7c   : > { %680 = dma.done.wait (%p507_p5), %s368_s18, 32  }
  0x7d   : > { %682 = vsyncadd (%p507_p5), %s368_s18, 4294967264  ;;  %s21_s14 = sadd.s32 1, %s705_s14   ;;  %s923_s9 = smov %s689_s10 }
  0x7e   : > { %p18_p12 = scmp.ge.s32.totalorder %s21_s14, 4   ;;  %s924_s10 = smov %s693_s11 }
  0x7f   : > { %s925_s11 = smov %s783_s23  ;;  %s926_s12 = smov %s701_s13 }
  0x80   : > { %s927_s13 = smov %s929_s17  ;;  %20 = sbr.rel (!%p18_p12) target bundleno = 8 (0x8), region = 90 }
  0x85   :  { %373 = vsyncpa [#allocation3], 1 }
  0x86   :  { %375 = vsyncpa [#allocation3 + $0x1], 1 }
  0x87   :  { %376 = vsyncpa [#allocation6], 1 }
  0x88   :  { %378 = vsyncpa [#allocation6 + $0x1], 1 }
  0x89   :  { %379 = vsyncpa [#allocation4], 1 }
  0x8a   :  { %381 = vsyncpa [#allocation4 + $0x1], 1 }

</bundles_post_ra>
